<compile_context>
chip_gen: v7x
topology: tpu7x:2x2x1
jax: 0.10.0
libtpu: 0.0.40
codegen_flags: <defaults>
</compile_context>

<pallas_src>
import jax
import jax.numpy as jnp
from jax.experimental import pallas as pl
from jax.experimental.pallas import tpu as pltpu


def _linear_kernel(x_ref, w_ref, b_ref, o_ref):
    # x_ref: (TM_F, fold*K)      -- lane-dense token tile (streamed)
    # w_ref: (fold*K, fold*N)    -- block-diagonal weight, VMEM-resident
    # b_ref: (1, fold*N) f32     -- tiled bias, VMEM-resident
    # o_ref: (TM_F, fold*N)      -- lane-dense output tile (streamed)
    acc = jnp.dot(x_ref[...], w_ref[...], preferred_element_type=jnp.float32)
    o_ref[...] = (acc + b_ref[...]).astype(o_ref.dtype)


def _choose_fold(width, out_features):
    # Smallest fold such that both fold*width and fold*out_features are
    # multiples of 128 -> unmasked, lane-dense loads and stores.
    if width % 128 == 0 and out_features % 128 == 0:
        return 1
    for f in (2, 4, 8, 16, 32, 64, 128):
        if (f * width) % 128 == 0 and (f * out_features) % 128 == 0:
            return f
    return 1


def _sublane_multiple(dtype):
    # (sublane, 128) minimum tile: 8 for 4-byte, 16 for 2-byte, 32 for 1-byte.
    return max(8, 32 // jnp.dtype(dtype).itemsize)


def _tm_f_cap():
    # Folded-row tile cap per TPU generation (scoped-VMEM-default aware):
    #   v5e: 16 MiB default scoped VMEM  -> cap 4096 folded rows
    #   v6e/v7x: 32 MiB default scoped   -> cap 8192 folded rows
    try:
        kind = jax.devices()[0].device_kind.lower()
    except Exception:  # pragma: no cover - defensive
        kind = ""
    if "v5" in kind:
        return 4096
    return 8192


def init_csi_recon_params(weight, bias, *, x_dtype=jnp.float32):
    """Precompute folded (block-diagonal) weight and tiled bias once at init."""
    out_features, width = weight.shape
    fold = _choose_fold(width, out_features)
    w_t = jnp.transpose(weight).astype(x_dtype)            # (width, out_features)
    w_bd = jnp.kron(jnp.eye(fold, dtype=x_dtype), w_t)     # (fold*K, fold*N)
    b_f = jnp.tile(bias.astype(jnp.float32), fold).reshape(1, fold * out_features)
    return {
        "weight": weight, "bias": bias,
        "w_bd": w_bd, "b_f": b_f,
        "fold": fold, "width": width, "out_features": out_features,
    }


def _xla_linear(x2d, weight, bias, out_dtype):
    return (x2d @ jnp.transpose(weight) + bias).astype(out_dtype)


def csi_recon_forward(x, params, *, tm_rows=None, min_tokens_for_pallas=1024):
    """y = x @ weight.T + bias  (PyTorch nn.Linear semantics).

    x: (..., width); params from init_csi_recon_params; returns (..., out_features).
    """
    fold = params["fold"]
    width = params["width"]
    out_features = params["out_features"]

    *lead, w_in = x.shape
    assert w_in == width, f"expected last dim {width}, got {w_in}"
    m = 1
    for d in lead:
        m *= d

    # Tiny problems: skip Pallas so XLA can fuse the linear with its neighbors.
    if m < max(min_tokens_for_pallas, fold):
        y2d = _xla_linear(x.reshape(m, width), params["weight"], params["bias"], x.dtype)
        return y2d.reshape(*lead, out_features)

    x2d = x.reshape(m, width)

    # Fold-aligned prefix through Pallas; tiny (< fold rows) tail via XLA.
    # No full-array pad / slice copies for ragged m.
    m_main = (m // fold) * fold
    x_main = x2d if m_main == m else x2d[:m_main]

    m_f = m_main // fold
    k_f = fold * width
    n_f = fold * out_features

    # Free (row-major contiguous) reshape: `fold` consecutive token rows become
    # one lane-dense row of length fold*width.
    x_f = x_main.reshape(m_f, k_f)

    sub = _sublane_multiple(x.dtype)           # dtype-aware sublane multiple
    cap_f = _tm_f_cap() if tm_rows is None else max(1, tm_rows // fold)

    if m_f <= sub:
        # Full-extent block: allowed even if not sublane-aligned (tiny input).
        tm_f = m_f
    else:
        tm_f = min(cap_f, m_f)
        if m_f >= 2 * sub:
            # Keep >= 2 grid tiles so both TensorCores get work on v7x.
            tm_f = min(tm_f, pl.cdiv(m_f, 2))
        tm_f = max(sub, (tm_f // sub) * sub)
    num_tiles = pl.cdiv(m_f, tm_f)

    itemsize = jnp.dtype(x.dtype).itemsize
    cost = pl.CostEstimate(
        # Actual block-diagonal matmul flops (not just the "useful" m*K*N).
        flops=2 * m_f * k_f * n_f,
        transcendentals=0,
        bytes_accessed=int(
            m_f * k_f * itemsize        # x (streamed)
            + k_f * n_f * itemsize      # weight (resident)
            + n_f * 4                   # bias (resident, f32)
            + m_f * n_f * itemsize      # y (streamed)
        ),
    )

    # NOTE: optional sweep -- pipeline_mode=pl.Buffered(3) on the x / out specs
    # if profiling ever shows exposed DMA at tile boundaries (default 2 is fine).
    out_f = pl.pallas_call(
        _linear_kernel,
        out_shape=jax.ShapeDtypeStruct((m_f, n_f), x.dtype),
        grid=(num_tiles,),
        in_specs=[
            pl.BlockSpec((tm_f, k_f), lambda i: (i, 0)),   # streamed token tiles
            pl.BlockSpec((k_f, n_f), lambda i: (0, 0)),    # weight: VMEM-resident
            pl.BlockSpec((1, n_f), lambda i: (0, 0)),      # bias: VMEM-resident
        ],
        out_specs=pl.BlockSpec((tm_f, n_f), lambda i: (i, 0)),
        compiler_params=pltpu.CompilerParams(
            dimension_semantics=("parallel",),             # shard tiles over TCs
        ),
        cost_estimate=cost,
    )(x_f, params["w_bd"], params["b_f"])

    # Free contiguous reshape back to token rows.
    y_main = out_f.reshape(m_main, out_features)

    if m_main != m:
        # TODO(synk): tail is < fold rows; handled by XLA to avoid any padding copies.
        y_tail = _xla_linear(x2d[m_main:], params["weight"], params["bias"], x.dtype)
        y2d = jnp.concatenate([y_main, y_tail], axis=0)
    else:
        y2d = y_main

    return y2d.reshape(*lead, out_features)


if __name__ == "__main__":
    # Shapes consistent with the module:
    #   width = 32 (hidden), patch_size_csi = 8, antennas = 4 -> out_features = 32
    width = 32
    patch_size_csi = 8
    antennas = 4
    out_features = antennas * patch_size_csi

    key = jax.random.PRNGKey(0)
    kx, kw, kb, kx2 = jax.random.split(key, 4)

    x = jax.random.normal(kx, (2, 8, width), dtype=jnp.float32)
    weight = jax.random.normal(kw, (out_features, width), dtype=jnp.float32) * 0.05
    bias = jax.random.normal(kb, (out_features,), dtype=jnp.float32) * 0.05

    # Precompute block-diagonal weight / tiled bias once (parameter-init time).
    params = init_csi_recon_params(weight, bias, x_dtype=x.dtype)

    # Force the Pallas path even at this tiny demo size so the kernel runs.
    y = csi_recon_forward(x, params, min_tokens_for_pallas=0)
    jax.block_until_ready(y)
    y_ref = x @ weight.T + bias
    assert y.shape == (2, 8, out_features)
    assert jnp.allclose(y, y_ref, atol=1e-3, rtol=1e-3)

    # Ragged token count (3*701 = 2103, not a multiple of fold=4):
    # exercises the fold-aligned Pallas prefix, a masked final grid tile, a
    # multi-tile "parallel" grid, and the tiny XLA tail path.
    x2 = jax.random.normal(kx2, (3, 701, width), dtype=jnp.float32)
    y2 = csi_recon_forward(x2, params, tm_rows=2048, min_tokens_for_pallas=0)
    jax.block_until_ready(y2)
    y2_ref = x2 @ weight.T + bias
    assert y2.shape == (3, 701, out_features)
    assert jnp.allclose(y2, y2_ref, atol=1e-3, rtol=1e-3)

    print("KERNEL_OK")
</pallas_src>

<mosaic_0001>
module attributes {stable_mosaic.version = 11 : i64} {
  func.func @_linear_kernel(%arg0: i32, %arg1: memref<4x128xf32, #tpu.memory_space<vmem>>, %arg2: memref<128x128xf32, #tpu.memory_space<vmem>>, %arg3: memref<1x128xf32, #tpu.memory_space<vmem>>, %arg4: memref<4x128xf32, #tpu.memory_space<vmem>>) attributes {dimension_semantics = [#tpu.dimension_semantics<parallel>], iteration_bounds = array<i64: 1>, scalar_prefetch = 0 : i64, scratch_operands = 0 : i64, tpu.core_type = #tpu.core_type<tc>, window_params = [{transform_indices = @transform_0, window_bounds = array<i64: 4, 128>}, {pipeline_mode = #tpu.pipeline_mode<synchronous>, transform_indices = @transform_1, window_bounds = array<i64: 128, 128>}, {pipeline_mode = #tpu.pipeline_mode<synchronous>, transform_indices = @transform_2, window_bounds = array<i64: 1, 128>}, {transform_indices = @transform_3, window_bounds = array<i64: 4, 128>}]} {
    %c0 = arith.constant 0 : index
    %c0_0 = arith.constant 0 : index
    %0 = vector.load %arg1[%c0, %c0_0] : memref<4x128xf32, #tpu.memory_space<vmem>>, vector<4x128xf32>
    %c0_1 = arith.constant 0 : index
    %c0_2 = arith.constant 0 : index
    %1 = vector.load %arg2[%c0_1, %c0_2] : memref<128x128xf32, #tpu.memory_space<vmem>>, vector<128x128xf32>
    %cst = arith.constant dense<0.000000e+00> : vector<4x128xf32>
    %2 = tpu.matmul %0, %1, %cst {dimension_numbers = #tpu.dot_dimension_numbers<[1], [0], [0], [1], [0, 0, 1, 1], [], []>} : vector<4x128xf32>, vector<128x128xf32>, vector<4x128xf32> -> vector<4x128xf32>
    %c0_3 = arith.constant 0 : index
    %c0_4 = arith.constant 0 : index
    %3 = vector.load %arg3[%c0_3, %c0_4] : memref<1x128xf32, #tpu.memory_space<vmem>>, vector<1x128xf32>
    %4 = vector.broadcast %3 : vector<1x128xf32> to vector<4x128xf32>
    %5 = arith.addf %2, %4 : vector<4x128xf32>
    %c0_5 = arith.constant 0 : index
    %c0_6 = arith.constant 0 : index
    %6 = vector.load %arg4[%c0_5, %c0_6] : memref<4x128xf32, #tpu.memory_space<vmem>>, vector<4x128xf32>
    tpu.vector_store %arg4[%c0_5, %c0_6], %5 {strides = array<i32>} : memref<4x128xf32, #tpu.memory_space<vmem>>, vector<4x128xf32>,
    return
  }
  func.func @transform_0(%arg0: i32) -> (i32, i32) {
    %c0_i32 = arith.constant 0 : i32
    %c0_i32_0 = arith.constant 0 : i32
    return %arg0, %c0_i32 : i32, i32
  }
  func.func @transform_1(%arg0: i32) -> (i32, i32) {
    %c0_i32 = arith.constant 0 : i32
    %c0_i32_0 = arith.constant 0 : i32
    %c0_i32_1 = arith.constant 0 : i32
    return %c0_i32, %c0_i32_0 : i32, i32
  }
  func.func @transform_2(%arg0: i32) -> (i32, i32) {
    %c0_i32 = arith.constant 0 : i32
    %c0_i32_0 = arith.constant 0 : i32
    %c0_i32_1 = arith.constant 0 : i32
    return %c0_i32, %c0_i32_0 : i32, i32
  }
  func.func @transform_3(%arg0: i32) -> (i32, i32) {
    %c0_i32 = arith.constant 0 : i32
    %c0_i32_0 = arith.constant 0 : i32
    return %arg0, %c0_i32 : i32, i32
  }
}

</mosaic_0001>

<bundles_post_ra>
// kernel: tpu_custom_call.1
= control target key start
LH: loop header
LB: loop body
LE: loop exit
PB: predicated region body
PF: predicated region fallthrough
CT: control target
= control target key end

     0   :  { %8 = vsyncpa [#allocation3], 0  ;;  %s383_s0 = inlined_call_operand.hbm [shape: f32[4,128], index: 0, kind: input, shape index: {}]   ;;  %s384_s1 = inlined_call_operand.hbm [shape: f32[128,128], index: 1, kind: input, shape index: {}]   ;;  %s385_s2 = inlined_call_operand.vmem [shape: f32[1,128], index: 2, kind: input, shape index: {}]   ;;  %s386_s3 = inlined_call_operand.hbm [shape: f32[4,128], index: 3, kind: output, shape index: {}]  }
   0x1   :  { %9 = vsyncpa [#allocation6], 0 }
   0x2   :  { %10 = vsyncpa [#allocation4], 0  ;;  %s309_s12 = smov [#allocation2]   ;;  %s310_s14 = smov [#allocation5]  }
   0x3   :  { %s17_s13 = sshll.u32 %s309_s12, 4  ;;  %s26_s15 = sshll.u32 %s310_s14, 4  ;;  %s18_s13 = int_to_ptr.vmem [resolvable:$true] %s17_s13  ;;  %s337_s15 = int_to_ptr.vmem [resolvable:$true] %s26_s15 }
   0x4   :  { %s237_s18 = scalar_lea.hbm %s383_s0, 64 }
   0x5   :  { %p238_p0 = scmp.ne.s32.totalorder %s383_s0, %s237_s18  ;;  %p241_p1 = scmp.lt.u32.totalorder %s237_s18, %s383_s0 }
   0x7   :  { %p243_p2 = pnand %p241_p1, %p238_p0 }
   0x9   :  { %246 = shalt.err (!%p243_p2)
}
   0xa   :  { %s247_s23 = scalar_lea.vmem %s18_s13, 64  ;;  %p252_p4 = scmp.lt.s32.totalorder %s18_s13, %s18_s13 }
   0xb   :  { %p248_p3 = scmp.ne.s32.totalorder %s18_s13, %s247_s23  ;;  %p253_p5 = scmp.lt.s32.totalorder %s247_s23, %s247_s23 }
   0xd   :  { %p254_p6 = por %p253_p5, %p252_p4 }
   0xf   :  { %p255_p7 = pnand %p254_p6, %p248_p3 }
  0x11   :  { %258 = shalt.err (!%p255_p7)
}
  0x12   :  { %20 = dma.hbm_to_vmem [thread:$0]  %s383_s0, 64, %s18_s13, [#allocation3]  }
  0x13   :  { %s259_s28 = scalar_lea.hbm %s384_s1, 2048 }
  0x14   :  { %p260_p8 = scmp.ne.s32.totalorder %s384_s1, %s259_s28  ;;  %p263_p9 = scmp.lt.u32.totalorder %s259_s28, %s384_s1 }
  0x16   :  { %p265_p10 = pnand %p263_p9, %p260_p8 }
  0x18   :  { %268 = shalt.err (!%p265_p10)
}
  0x19   :  { %s269_s6 = scalar_lea.vmem %s337_s15, 2048  ;;  %p274_p12 = scmp.lt.s32.totalorder %s337_s15, %s337_s15 }
  0x1a   :  { %p270_p11 = scmp.ne.s32.totalorder %s337_s15, %s269_s6  ;;  %p275_p13 = scmp.lt.s32.totalorder %s269_s6, %s269_s6 }
  0x1c   :  { %p276_p0 = por %p275_p13, %p274_p12 }
  0x1e   :  { %p277_p1 = pnand %p276_p0, %p270_p11 }
  0x20   :  { %280 = shalt.err (!%p277_p1)
}
  0x21   :  { %s311_s0 = smov 128   ;;  %s312_s7 = smov 8  }
  0x22   :  { %32 = dma.hbm_to_vmem [thread:$0]  %s384_s1, 2048, %s337_s15, [#allocation6], %s311_s0, %s311_s0, %s312_s7  }
  0x23   :  { %303 = dma.done.wait [#allocation3], 64  }
  0x24   :  { %304 = vsyncadd [#allocation3], 4294967232 }
  0x25   :  { %305 = dma.done.wait [#allocation6], 2048  }
  0x26   :  { %306 = vsyncadd [#allocation6], 4294965248  ;;  %v313_v0 = vmov 0.0|0.0   ;;  %vm314_vm0 = vmmov 0   ;;  %v315_v1 = vmov 0.0   ;;  %v42_v2 = vld [vmem:[#allocation5] sm:$0xff] }
  0x27   :  { %205 = vmatprep.subr.bf16.mxu0 %v313_v0  ;;  %202 = vmatprep.mubr.msk.f32.mxu0 %vm314_vm0, %v315_v1  ;;  %v43_v3 = vld [vmem:[#allocation5 + $0x8] sm:$0xff]  ;;  %v44_v4 = vld [vmem:[#allocation5 + $0x10] sm:$0xff]  ;;  %v45_v6 = vld [vmem:[#allocation5 + $0x18] sm:$0xff]  ;;  %s316_s11 = smov [#allocation7]  }
  0x28   :  { %v206_v5 = vpack.c.bf16 %v43_v3, %v42_v2  ;;  %v209_v7 = vpack.c.bf16 %v45_v6, %v44_v4  ;;  %v46_v8 = vld [vmem:[#allocation5 + $0x20] sm:$0xff]  ;;  %v47_v9 = vld [vmem:[#allocation5 + $0x28] sm:$0xff]  ;;  %v48_v11 = vld [vmem:[#allocation5 + $0x30] sm:$0xff]  ;;  %s142_s12 = sshll.u32 %s316_s11, 4  ;;  %s143_s12 = int_to_ptr.vmem [resolvable:$true] %s142_s12 }
  0x29   :  { %v212_v10 = vpack.c.bf16 %v47_v9, %v46_v8  ;;  %v49_v12 = vld [vmem:[#allocation5 + $0x38] sm:$0xff]  ;;  %v50_v14 = vld [vmem:[#allocation5 + $0x40] sm:$0xff]  ;;  %v51_v15 = vld [vmem:[#allocation5 + $0x48] sm:$0xff]  ;;  %s281_s13 = scalar_lea.vmem %s143_s12, 64  ;;  %p286_p3 = scmp.lt.s32.totalorder %s143_s12, %s143_s12 }
  0x2a   :  { %207 = vmatpush3.bf16.msra.mxu0 %v206_v5  ;;  %v215_v13 = vpack.c.bf16 %v49_v12, %v48_v11  ;;  %v218_v16 = vpack.c.bf16 %v51_v15, %v50_v14  ;;  %v52_v17 = vld [vmem:[#allocation5 + $0x50] sm:$0xff]  ;;  %v53_v18 = vld [vmem:[#allocation5 + $0x58] sm:$0xff]  ;;  %v54_v20 = vld [vmem:[#allocation5 + $0x60] sm:$0xff]  ;;  %p282_p2 = scmp.ne.s32.totalorder %s143_s12, %s281_s13  ;;  %p287_p4 = scmp.lt.s32.totalorder %s281_s13, %s281_s13 }
  0x2b   :  { %208 = vmatprep.subr.bf16.mxu0 %v313_v0  ;;  %v221_v19 = vpack.c.bf16 %v53_v18, %v52_v17  ;;  %v55_v21 = vld [vmem:[#allocation5 + $0x68] sm:$0xff]  ;;  %v56_v23 = vld [vmem:[#allocation5 + $0x70] sm:$0xff]  ;;  %v57_v24 = vld [vmem:[#allocation5 + $0x78] sm:$0xff] }
  0x2c   :  { %v224_v22 = vpack.c.bf16 %v55_v21, %v54_v20  ;;  %v227_v25 = vpack.c.bf16 %v57_v24, %v56_v23  ;;  %v41_v26 = vld [vmem:[#allocation2] sm:$0xf]  ;;  %p288_p5 = por %p287_p4, %p286_p3 }
  0x2d   :  { %v152_v27 = vld [vmem:[%s385_s2] ss:$0 sm:$0xff] }
  0x2e   :  { %210 = vmatpush3.bf16.msra.mxu0 %v209_v7  ;;  %p289_p6 = pnand %p288_p5, %p282_p2 }
  0x2f   :  { %211 = vmatprep.subr.bf16.mxu0 %v313_v0 }
  0x32   :  { %213 = vmatpush3.bf16.msra.mxu0 %v212_v10 }
  0x33   :  { %214 = vmatprep.subr.bf16.mxu0 %v313_v0 }
  0x36   :  { %216 = vmatpush3.bf16.msra.mxu0 %v215_v13 }
  0x37   :  { %217 = vmatprep.subr.bf16.mxu0 %v313_v0 }
  0x3a   :  { %219 = vmatpush3.bf16.msra.mxu0 %v218_v16 }
  0x3b   :  { %220 = vmatprep.subr.bf16.mxu0 %v313_v0 }
  0x3e   :  { %222 = vmatpush3.bf16.msra.mxu0 %v221_v19 }
  0x3f   :  { %223 = vmatprep.subr.bf16.mxu0 %v313_v0 }
  0x42   :  { %225 = vmatpush3.bf16.msra.mxu0 %v224_v22 }
  0x43   :  { %226 = vmatprep.subr.bf16.mxu0 %v313_v0 }
  0x46   :  { %228 = vmatpush3.bf16.msra.mxu0 %v227_v25 }
  0x49   :  { %203 = vmatmul.mubr.f32.vlgmr.msra.gmra.mrb[0].mxu0 %v41_v26 }
 0x11c   :  { %v131_v28 = vpop.f32.mrb[0].mxu0 }
 0x11d   :  { %v132_v29 = vadd.f32 %v152_v27, %v131_v28  ;;  %v204_v30 = vpop.f32.mrb[1].mxu0 }
 0x11f   :  { %135 = vst [vmem:[#allocation7] sm:$0xf] %v132_v29 }
 0x120   :  { %292 = shalt.err (!%p289_p6)
}
 0x121   :  { %s293_s16 = scalar_lea.hbm %s386_s3, 64 }
 0x122   :  { %p294_p7 = scmp.ne.s32.totalorder %s386_s3, %s293_s16  ;;  %p297_p8 = scmp.lt.u32.totalorder %s293_s16, %s386_s3 }
 0x124   :  { %p299_p9 = pnand %p297_p8, %p294_p7 }
 0x126   :  { %302 = shalt.err (!%p299_p9)
}
 0x127   :  { %145 = dma.vmem_to_hbm [thread:$0]  %s143_s12, 64, %s386_s3, [#allocation4]  }
 0x128   :  { %307 = dma.done.wait [#allocation4], 64  }
 0x129   :  { %308 = vsyncadd [#allocation4], 4294967232 }
 0x12a   :  { %149 = vsyncpa [#allocation3], 1 }
 0x12b   :  { %150 = vsyncpa [#allocation6], 1 }
 0x12c   :  { %151 = vsyncpa [#allocation4], 1 }

</bundles_post_ra>
